<compile_context>
chip_gen: v7x
topology: tpu7x:2x2x1
jax: 0.10.0
libtpu: 0.0.40
codegen_flags: <defaults>
</compile_context>

<pallas_src>
import functools

import jax
import jax.numpy as jnp
from jax.experimental import pallas as pl
from jax.experimental.pallas import tpu as pltpu


_BF16 = jnp.bfloat16
_F32 = jnp.float32
_MAX_FULL_K = 4608                    # largest contraction dim kept un-tiled
_VMEM_LIMIT = 48 * 1024 * 1024        # explicit budget, headroom below v7x 64MiB


def _round_up(x, m):
    return ((x + m - 1) // m) * m


# ----------------------------------------------------------------------------
# Pallas kernels
# ----------------------------------------------------------------------------

def _mm_epilogue_kernel(a_ref, b_ref, s_ref, t_ref, o_ref, acc_ref, *, relu):
    """Tiled MXU matmul with fused per-column scale/shift (+ReLU) epilogue."""
    @pl.when(pl.program_id(2) == 0)
    def _():
        acc_ref[...] = jnp.zeros_like(acc_ref)

    acc_ref[...] += jnp.dot(a_ref[...], b_ref[...],
                            preferred_element_type=jnp.float32)

    @pl.when(pl.program_id(2) == pl.num_programs(2) - 1)
    def _():
        y = acc_ref[...] * s_ref[...] + t_ref[...]
        if relu:
            y = jnp.maximum(y, 0.0)
        o_ref[...] = y.astype(o_ref.dtype)


def _mm_epilogue_res_kernel(a_ref, b_ref, s_ref, t_ref, r_ref, o_ref, acc_ref):
    """Tiled MXU matmul with fused scale/shift + residual add + ReLU epilogue."""
    @pl.when(pl.program_id(2) == 0)
    def _():
        acc_ref[...] = jnp.zeros_like(acc_ref)

    acc_ref[...] += jnp.dot(a_ref[...], b_ref[...],
                            preferred_element_type=jnp.float32)

    @pl.when(pl.program_id(2) == pl.num_programs(2) - 1)
    def _():
        y = (acc_ref[...] * s_ref[...] + t_ref[...]
             + r_ref[...].astype(jnp.float32))
        o_ref[...] = jnp.maximum(y, 0.0).astype(o_ref.dtype)


def _affine_kernel(x_ref, s_ref, t_ref, o_ref, *, relu):
    y = x_ref[...].astype(jnp.float32) * s_ref[...] + t_ref[...]
    if relu:
        y = jnp.maximum(y, 0.0)
    o_ref[...] = y.astype(o_ref.dtype)


def _ibn_relu_kernel(x_ref, g_ref, b_ref, s_ref, t_ref, o_ref, *, half):
    """Fused IBN + ReLU on one sample.

    Channels [0, half) use InstanceNorm (per-sample spatial statistics,
    affine gamma/beta); channels [half, C) use the eval-mode BatchNorm affine.
    The full channel width C stays on the lane axis (no split / concat)."""
    x = x_ref[...].astype(jnp.float32)                         # (1, HW, C)
    mean = jnp.mean(x, axis=1, keepdims=True)                  # (1, 1, C)
    var = jnp.mean(jnp.square(x - mean), axis=1, keepdims=True)
    rstd = jax.lax.rsqrt(var + 1e-5)
    in_scale = g_ref[...] * rstd
    in_shift = b_ref[...] - mean * in_scale
    ch = jax.lax.broadcasted_iota(jnp.int32, in_scale.shape, 2)
    scale = jnp.where(ch < half, in_scale, s_ref[...])
    shift = jnp.where(ch < half, in_shift, t_ref[...])
    o_ref[...] = jnp.maximum(x * scale + shift, 0.0).astype(o_ref.dtype)


def _max9_kernel(x_ref, o_ref):
    o_ref[...] = jnp.max(x_ref[...], axis=0)


def _mean_kernel(x_ref, o_ref):
    o_ref[...] = jnp.mean(x_ref[...].astype(jnp.float32), axis=1,
                          keepdims=True).astype(o_ref.dtype)


# ----------------------------------------------------------------------------
# Pallas wrappers
# ----------------------------------------------------------------------------

@functools.partial(jax.jit, static_argnames=("relu", "out_dtype"))
def matmul_fused(a, b, scale, shift, residual=None, *, relu=False,
                 out_dtype=_BF16):
    """out = epilogue(a @ b): column-wise scale/shift (+ residual add)(+ ReLU).

    Operands are cast to bf16 for the MXU; accumulation is f32.  The K axis is
    kept as a single full-extent block when it fits (no K padding / no patch
    slab copy); M/N are padded only when needed.
    """
    M, K = a.shape
    N = b.shape[1]
    tm = min(256, _round_up(M, 8))
    tn = min(256, _round_up(N, 128))
    tk = K if K <= _MAX_FULL_K else 512
    Mp, Np, Kp = _round_up(M, tm), _round_up(N, tn), _round_up(K, tk)

    a_p = a.astype(_BF16)
    if (Mp, Kp) != (M, K):
        a_p = jnp.pad(a_p, ((0, Mp - M), (0, Kp - K)))
    b_p = b.astype(_BF16)
    if (Kp, Np) != (K, N):
        b_p = jnp.pad(b_p, ((0, Kp - K), (0, Np - N)))
    s_p = scale.reshape(1, N).astype(_F32)
    t_p = shift.reshape(1, N).astype(_F32)
    if Np != N:
        s_p = jnp.pad(s_p, ((0, 0), (0, Np - N)))
        t_p = jnp.pad(t_p, ((0, 0), (0, Np - N)))

    in_specs = [pl.BlockSpec((tm, tk), lambda i, j, k: (i, k)),
                pl.BlockSpec((tk, tn), lambda i, j, k: (k, j)),
                pl.BlockSpec((1, tn), lambda i, j, k: (0, j)),
                pl.BlockSpec((1, tn), lambda i, j, k: (0, j))]
    args = [a_p, b_p, s_p, t_p]
    if residual is None:
        kernel = functools.partial(_mm_epilogue_kernel, relu=relu)
    else:
        r_p = residual.astype(_BF16)
        if (Mp, Np) != residual.shape:
            r_p = jnp.pad(r_p, ((0, Mp - M), (0, Np - N)))
        in_specs.append(pl.BlockSpec((tm, tn), lambda i, j, k: (i, j)))
        args.append(r_p)
        kernel = _mm_epilogue_res_kernel

    out = pl.pallas_call(
        kernel,
        out_shape=jax.ShapeDtypeStruct((Mp, Np), out_dtype),
        grid=(Mp // tm, Np // tn, Kp // tk),
        in_specs=in_specs,
        out_specs=pl.BlockSpec((tm, tn), lambda i, j, k: (i, j)),
        scratch_shapes=[pltpu.VMEM((tm, tn), jnp.float32)],
        compiler_params=pltpu.CompilerParams(
            dimension_semantics=("parallel", "parallel", "arbitrary"),
            vmem_limit_bytes=_VMEM_LIMIT),
    )(*args)
    if (Mp, Np) != (M, N):
        out = out[:M, :N]
    return out


@functools.partial(jax.jit, static_argnames=("k", "stride", "pad", "relu"))
def conv2d_fused(x, w_mat, scale, shift, residual=None, *, k, stride, pad,
                 relu=False):
    """Conv2d (no bias, NHWC) via im2col + Pallas matmul, with the following
    BatchNorm affine / ReLU / residual add fused into the matmul epilogue.

    w_mat: (k*k*Cin, Cout) laid out in (kh, kw, Cin) patch order.
    """
    B, H, W, Cin = x.shape
    Cout = w_mat.shape[1]
    if k == 1 and pad == 0:
        xs = x[:, ::stride, ::stride, :]
        Ho, Wo = xs.shape[1], xs.shape[2]
        patches = xs.reshape(B * Ho * Wo, Cin)
    else:
        # TODO(synk): im2col still materializes the (k*k*Cin)-wide patch
        #             matrix in HBM; a halo/manual-DMA conv kernel would
        #             avoid the k*k read amplification.
        xp = jnp.pad(x, ((0, 0), (pad, pad), (pad, pad), (0, 0)))
        Ho = (H + 2 * pad - k) // stride + 1
        Wo = (W + 2 * pad - k) // stride + 1
        cols = [xp[:, i:i + stride * Ho:stride, j:j + stride * Wo:stride, :]
                for i in range(k) for j in range(k)]
        patches = jnp.concatenate(cols, axis=-1).reshape(B * Ho * Wo,
                                                         k * k * Cin)
    res = None if residual is None else residual.reshape(B * Ho * Wo, Cout)
    out = matmul_fused(patches, w_mat, scale, shift, res, relu=relu,
                       out_dtype=_BF16)
    return out.reshape(B, Ho, Wo, Cout)


@functools.partial(jax.jit, static_argnames=("half",))
def ibn_relu(x, in_g, in_b, bn_s, bn_t, *, half):
    """Fused IBN + ReLU, one sample per grid step.  x: NHWC."""
    B, H, W, C = x.shape
    xr = x.reshape(B, H * W, C)

    def vec(v):
        return v.reshape(1, 1, C).astype(_F32)

    out = pl.pallas_call(
        functools.partial(_ibn_relu_kernel, half=half),
        out_shape=jax.ShapeDtypeStruct((B, H * W, C), x.dtype),
        grid=(B,),
        in_specs=[pl.BlockSpec((1, H * W, C), lambda i: (i, 0, 0))]
                 + [pl.BlockSpec((1, 1, C), lambda i: (0, 0, 0))] * 4,
        out_specs=pl.BlockSpec((1, H * W, C), lambda i: (i, 0, 0)),
        compiler_params=pltpu.CompilerParams(
            dimension_semantics=("parallel",)),
    )(xr, vec(in_g), vec(in_b), vec(bn_s), vec(bn_t))
    return out.reshape(B, H, W, C)


@functools.partial(jax.jit, static_argnames=("relu",))
def affine(x, scale, shift, *, relu=False):
    """Per-column scale/shift (+ optional ReLU) on an (M, C) slab, row-tiled."""
    M, C = x.shape
    tm = min(512, _round_up(M, 8))
    Mp = _round_up(M, tm)
    x_p = x if Mp == M else jnp.pad(x, ((0, Mp - M), (0, 0)))
    out = pl.pallas_call(
        functools.partial(_affine_kernel, relu=relu),
        out_shape=jax.ShapeDtypeStruct((Mp, C), x.dtype),
        grid=(Mp // tm,),
        in_specs=[pl.BlockSpec((tm, C), lambda i: (i, 0)),
                  pl.BlockSpec((1, C), lambda i: (0, 0)),
                  pl.BlockSpec((1, C), lambda i: (0, 0))],
        out_specs=pl.BlockSpec((tm, C), lambda i: (i, 0)),
        compiler_params=pltpu.CompilerParams(
            dimension_semantics=("parallel",)),
    )(x_p, scale.reshape(1, C).astype(_F32), shift.reshape(1, C).astype(_F32))
    return out if Mp == M else out[:M]


@jax.jit
def maxpool_3x3_s2_p1(x):
    """MaxPool2d(kernel=3, stride=2, padding=1) on NHWC, row-tiled."""
    B, H, W, C = x.shape
    xp = jnp.pad(x, ((0, 0), (1, 1), (1, 1), (0, 0)),
                 constant_values=-jnp.inf)
    Ho = (H + 2 - 3) // 2 + 1
    Wo = (W + 2 - 3) // 2 + 1
    # TODO(synk): the 9 window taps are gathered in plain JAX (9x HBM copy);
    #             the kernel itself is tiled so VMEM stays bounded.
    cols = [xp[:, i:i + 2 * Ho:2, j:j + 2 * Wo:2, :]
            for i in range(3) for j in range(3)]
    M = B * Ho * Wo
    stacked = jnp.stack(cols, axis=0).reshape(9, M, C)
    tm = min(512, _round_up(M, 8))
    Mp = _round_up(M, tm)
    if Mp != M:
        stacked = jnp.pad(stacked, ((0, 0), (0, Mp - M), (0, 0)))
    out = pl.pallas_call(
        _max9_kernel,
        out_shape=jax.ShapeDtypeStruct((Mp, C), x.dtype),
        grid=(Mp // tm,),
        in_specs=[pl.BlockSpec((9, tm, C), lambda i: (0, i, 0))],
        out_specs=pl.BlockSpec((tm, C), lambda i: (i, 0)),
        compiler_params=pltpu.CompilerParams(
            dimension_semantics=("parallel",)),
    )(stacked)
    return out[:M].reshape(B, Ho, Wo, C)


@jax.jit
def global_avgpool(x):
    """AdaptiveAvgPool2d((1,1)) + flatten: NHWC -> (B, C), one sample / step."""
    B, H, W, C = x.shape
    xr = x.reshape(B, H * W, C)
    out = pl.pallas_call(
        _mean_kernel,
        out_shape=jax.ShapeDtypeStruct((B, 1, C), jnp.float32),
        grid=(B,),
        in_specs=[pl.BlockSpec((1, H * W, C), lambda i: (i, 0, 0))],
        out_specs=pl.BlockSpec((1, 1, C), lambda i: (i, 0, 0)),
        compiler_params=pltpu.CompilerParams(
            dimension_semantics=("parallel",)),
    )(xr)
    return out.reshape(B, C)


@jax.jit
def linear_fused(x, w_t, b):
    """nn.Linear: y = x @ W^T + b with the bias fused into the epilogue."""
    return matmul_fused(x, w_t, jnp.ones_like(b), b, relu=False,
                        out_dtype=jnp.float32)


# ----------------------------------------------------------------------------
# Model glue (plain JAX composition of the Pallas kernels)
# ----------------------------------------------------------------------------

def bottleneck_forward(x, p):
    width = p["conv2"].shape[1]
    ones = jnp.ones((width,), _F32)
    zeros = jnp.zeros((width,), _F32)
    # conv1 (1x1): IBN follows, so no norm fused here (identity epilogue).
    out = conv2d_fused(x, p["conv1"], ones, zeros, k=1, stride=1, pad=0,
                       relu=False)
    out = ibn_relu(out, p["in_g"], p["in_b"], p["bn1_s"], p["bn1_t"],
                   half=p["half"])
    # conv2 (3x3, possibly strided) + BN2 + ReLU fused.
    out = conv2d_fused(out, p["conv2"], p["bn2"][0], p["bn2"][1], k=3,
                       stride=p["stride"], pad=1, relu=True)
    # identity / downsample (conv + BN fused, no ReLU).
    if "dconv" in p:
        identity = conv2d_fused(x, p["dconv"], p["dbn"][0], p["dbn"][1],
                                k=1, stride=p["stride"], pad=0, relu=False)
    else:
        identity = x
    # conv3 (1x1) + BN3 + residual add + ReLU fused.
    out = conv2d_fused(out, p["conv3"], p["bn3"][0], p["bn3"][1], identity,
                       k=1, stride=1, pad=0, relu=True)
    return out


def forward(x_nchw, params):
    x = jnp.transpose(x_nchw, (0, 2, 3, 1)).astype(_BF16)   # NCHW -> NHWC
    x = conv2d_fused(x, params["conv1"], params["bn1"][0], params["bn1"][1],
                     k=7, stride=2, pad=3, relu=True)
    x = maxpool_3x3_s2_p1(x)
    for name in ("layer1", "layer2", "layer3", "layer4"):
        for bp in params[name]:
            x = bottleneck_forward(x, bp)
    pooled = global_avgpool(x)                               # (B, 2048) f32
    feat = linear_fused(pooled, params["fc1"][0], params["fc1"][1])
    feat_bn = affine(feat, params["featbn"][0], params["featbn"][1],
                     relu=False)
    logits = linear_fused(feat_bn, params["fc2"][0], params["fc2"][1])
    return feat, feat_bn, logits


# ----------------------------------------------------------------------------
# Deterministic parameter construction (matches module __init__ shapes)
# ----------------------------------------------------------------------------

def init_params(key, num_classes):
    eps = 1e-5
    keys = list(jax.random.split(key, 512))
    kidx = [0]

    def nk():
        k = keys[kidx[0]]
        kidx[0] += 1
        return k

    def conv_w(cout, cin, k):
        fan_out = cout * k * k                       # kaiming_normal_ fan_out
        std = (2.0 / fan_out) ** 0.5
        w = jax.random.normal(nk(), (cout, cin, k, k), jnp.float32) * std
        # OIHW -> (kh, kw, Cin, Cout) -> (k*k*Cin, Cout) to match im2col order
        return jnp.transpose(w, (2, 3, 1, 0)).reshape(k * k * cin,
                                                      cout).astype(_BF16)

    def bn_params(c):
        gamma = jnp.ones((c,), jnp.float32)
        beta = jnp.zeros((c,), jnp.float32)
        mean = jnp.zeros((c,), jnp.float32)
        var = jnp.ones((c,), jnp.float32)
        scale = gamma / jnp.sqrt(var + eps)
        return scale, beta - mean * scale

    def linear_w(cout, cin):
        bound = 1.0 / (cin ** 0.5)
        w = jax.random.uniform(nk(), (cout, cin), jnp.float32, -bound, bound)
        b = jax.random.uniform(nk(), (cout,), jnp.float32, -bound, bound)
        return w.T.astype(_BF16), b                  # store (in, out)

    def bottleneck_p(inplanes, planes, stride, has_down):
        width = planes
        half = width // 2
        bn1 = bn_params(width - half)                # eval-mode BN on 2nd half
        zeros_h = jnp.zeros((half,), jnp.float32)
        p = {"stride": stride, "half": half,
             "conv1": conv_w(width, inplanes, 1),
             # IBN params padded to the full channel width C (lane-dense):
             "in_g": jnp.concatenate([jnp.ones((half,), jnp.float32),
                                      jnp.zeros((width - half,), jnp.float32)]),
             "in_b": jnp.zeros((width,), jnp.float32),
             "bn1_s": jnp.concatenate([zeros_h, bn1[0]]),
             "bn1_t": jnp.concatenate([zeros_h, bn1[1]]),
             "conv2": conv_w(width, width, 3),
             "bn2": bn_params(width),
             "conv3": conv_w(planes * 4, width, 1),
             "bn3": bn_params(planes * 4)}
        if has_down:
            p["dconv"] = conv_w(planes * 4, inplanes, 1)
            p["dbn"] = bn_params(planes * 4)
        return p

    params = {"conv1": conv_w(64, 3, 7), "bn1": bn_params(64)}
    inplanes = 64
    cfg = [(64, 3, 1), (128, 4, 2), (256, 6, 2), (512, 3, 1)]  # layer4 stride=1
    for li, (planes, blocks, stride) in enumerate(cfg, start=1):
        layer = []
        has_down = (stride != 1) or (inplanes != planes * 4)
        layer.append(bottleneck_p(inplanes, planes, stride, has_down))
        inplanes = planes * 4
        for _ in range(1, blocks):
            layer.append(bottleneck_p(inplanes, planes, 1, False))
        params[f"layer{li}"] = layer

    params["fc1"] = linear_w(2048, 2048)
    params["featbn"] = bn_params(2048)
    params["fc2"] = linear_w(num_classes, 2048)
    return params


# ----------------------------------------------------------------------------

if __name__ == "__main__":
    key = jax.random.PRNGKey(0)
    pkey, xkey = jax.random.split(key)
    num_classes = 16
    params = init_params(pkey, num_classes)
    # PyTorch-convention NCHW input; 3 channels are required by conv1.
    x = jax.random.normal(xkey, (2, 3, 32, 32), jnp.float32)
    feat, feat_bn, logits = forward(x, params)
    (feat, feat_bn, logits) = jax.block_until_ready((feat, feat_bn, logits))
    assert feat.shape == (2, 2048)
    assert feat_bn.shape == (2, 2048)
    assert logits.shape == (2, num_classes)
    assert bool(jnp.isfinite(feat).all())
    assert bool(jnp.isfinite(feat_bn).all())
    assert bool(jnp.isfinite(logits).all())
    print("KERNEL_OK")
</pallas_src>

<mosaic_0001>
module attributes {stable_mosaic.version = 11 : i64} {
  func.func @_mm_epilogue_kernel(%arg0: i32, %arg1: i32, %arg2: i32, %arg3: memref<256x147xbf16, #tpu.memory_space<vmem>>, %arg4: memref<147x128xbf16, #tpu.memory_space<vmem>>, %arg5: memref<1x128xf32, #tpu.memory_space<vmem>>, %arg6: memref<1x128xf32, #tpu.memory_space<vmem>>, %arg7: memref<256x128xbf16, #tpu.memory_space<vmem>>, %arg8: memref<256x128xf32, #tpu.memory_space<vmem>>) attributes {dimension_semantics = [#tpu.dimension_semantics<parallel>, #tpu.dimension_semantics<parallel>, #tpu.dimension_semantics<arbitrary>], iteration_bounds = array<i64: 2, 1, 1>, scalar_prefetch = 0 : i64, scratch_operands = 1 : i64, tpu.core_type = #tpu.core_type<tc>, window_params = [{transform_indices = @transform_0, window_bounds = array<i64: 256, 147>}, {transform_indices = @transform_1, window_bounds = array<i64: 147, 128>}, {transform_indices = @transform_2, window_bounds = array<i64: 1, 128>}, {transform_indices = @transform_3, window_bounds = array<i64: 1, 128>}, {transform_indices = @transform_4, window_bounds = array<i64: 256, 128>}]} {
    %c0_i32 = arith.constant 0 : i32
    %0 = arith.cmpi eq, %arg2, %c0_i32 : i32
    %1 = arith.extui %0 : i1 to i32
    %c0_i32_0 = arith.constant 0 : i32
    %2 = arith.cmpi ne, %1, %c0_i32_0 : i32
    scf.if %2 {
      %cst_10 = arith.constant 0.000000e+00 : f32
      %12 = vector.broadcast %cst_10 : f32 to vector<256x128xf32>
      %c0_11 = arith.constant 0 : index
      %c0_12 = arith.constant 0 : index
      %13 = vector.load %arg8[%c0_11, %c0_12] : memref<256x128xf32, #tpu.memory_space<vmem>>, vector<256x128xf32>
      tpu.vector_store %arg8[%c0_11, %c0_12], %12 {strides = array<i32>} : memref<256x128xf32, #tpu.memory_space<vmem>>, vector<256x128xf32>,
    } else {
    }
    %c0 = arith.constant 0 : index
    %c0_1 = arith.constant 0 : index
    %3 = vector.load %arg8[%c0, %c0_1] : memref<256x128xf32, #tpu.memory_space<vmem>>, vector<256x128xf32>
    %c0_2 = arith.constant 0 : index
    %c0_3 = arith.constant 0 : index
    %4 = vector.load %arg3[%c0_2, %c0_3] : memref<256x147xbf16, #tpu.memory_space<vmem>>, vector<256x147xbf16>
    %c0_4 = arith.constant 0 : index
    %c0_5 = arith.constant 0 : index
    %5 = vector.load %arg4[%c0_4, %c0_5] : memref<147x128xbf16, #tpu.memory_space<vmem>>, vector<147x128xbf16>
    %cst = arith.constant dense<0.000000e+00> : vector<256x128xf32>
    %6 = tpu.matmul %4, %5, %cst {dimension_numbers = #tpu.dot_dimension_numbers<[1], [0], [0], [1], [0, 0, 1, 1], [], []>} : vector<256x147xbf16>, vector<147x128xbf16>, vector<256x128xf32> -> vector<256x128xf32>
    %7 = arith.addf %3, %6 : vector<256x128xf32>
    %c0_6 = arith.constant 0 : index
    %c0_7 = arith.constant 0 : index
    %8 = vector.load %arg8[%c0_6, %c0_7] : memref<256x128xf32, #tpu.memory_space<vmem>>, vector<256x128xf32>
    tpu.vector_store %arg8[%c0_6, %c0_7], %7 {strides = array<i32>} : memref<256x128xf32, #tpu.memory_space<vmem>>, vector<256x128xf32>,
    %c0_i32_8 = arith.constant 0 : i32
    %9 = arith.cmpi eq, %arg2, %c0_i32_8 : i32
    %10 = arith.extui %9 : i1 to i32
    %c0_i32_9 = arith.constant 0 : i32
    %11 = arith.cmpi ne, %10, %c0_i32_9 : i32
    scf.if %11 {
      %c0_10 = arith.constant 0 : index
      %c0_11 = arith.constant 0 : index
      %12 = vector.load %arg8[%c0_10, %c0_11] : memref<256x128xf32, #tpu.memory_space<vmem>>, vector<256x128xf32>
      %c0_12 = arith.constant 0 : index
      %c0_13 = arith.constant 0 : index
      %13 = vector.load %arg5[%c0_12, %c0_13] : memref<1x128xf32, #tpu.memory_space<vmem>>, vector<1x128xf32>
      %14 = vector.broadcast %13 : vector<1x128xf32> to vector<256x128xf32>
      %15 = arith.mulf %12, %14 : vector<256x128xf32>
      %c0_14 = arith.constant 0 : index
      %c0_15 = arith.constant 0 : index
      %16 = vector.load %arg6[%c0_14, %c0_15] : memref<1x128xf32, #tpu.memory_space<vmem>>, vector<1x128xf32>
      %17 = vector.broadcast %16 : vector<1x128xf32> to vector<256x128xf32>
      %18 = arith.addf %15, %17 : vector<256x128xf32>
      %cst_16 = arith.constant 0.000000e+00 : f32
      %19 = vector.broadcast %cst_16 : f32 to vector<256x128xf32>
      %20 = arith.maximumf %18, %19 : vector<256x128xf32>
      %21 = arith.truncf %20 : vector<256x128xf32> to vector<256x128xbf16>
      %c0_17 = arith.constant 0 : index
      %c0_18 = arith.constant 0 : index
      %22 = vector.load %arg7[%c0_17, %c0_18] : memref<256x128xbf16, #tpu.memory_space<vmem>>, vector<256x128xbf16>
      tpu.vector_store %arg7[%c0_17, %c0_18], %21 {strides = array<i32>} : memref<256x128xbf16, #tpu.memory_space<vmem>>, vector<256x128xbf16>,
    } else {
    }
    return
  }
  func.func @transform_0(%arg0: i32, %arg1: i32, %arg2: i32) -> (i32, i32) {
    %c0_i32 = arith.constant 0 : i32
    return %arg0, %arg2 : i32, i32
  }
  func.func @transform_1(%arg0: i32, %arg1: i32, %arg2: i32) -> (i32, i32) {
    %c0_i32 = arith.constant 0 : i32
    return %arg2, %arg1 : i32, i32
  }
  func.func @transform_2(%arg0: i32, %arg1: i32, %arg2: i32) -> (i32, i32) {
    %c0_i32 = arith.constant 0 : i32
    %c0_i32_0 = arith.constant 0 : i32
    return %c0_i32, %arg1 : i32, i32
  }
  func.func @transform_3(%arg0: i32, %arg1: i32, %arg2: i32) -> (i32, i32) {
    %c0_i32 = arith.constant 0 : i32
    %c0_i32_0 = arith.constant 0 : i32
    return %c0_i32, %arg1 : i32, i32
  }
  func.func @transform_4(%arg0: i32, %arg1: i32, %arg2: i32) -> (i32, i32) {
    %c0_i32 = arith.constant 0 : i32
    return %arg0, %arg1 : i32, i32
  }
}

</mosaic_0001>

<bundles_post_ra>
// kernel: matmul_fused.1
= control target key start
LH: loop header
LB: loop body
LE: loop exit
PB: predicated region body
PF: predicated region fallthrough
CT: control target
= control target key end

     0   :  { %s1731_s15 = smov 0   ;;  %s1733_s16 = smov 0   ;;  %s1940_s0 = inlined_call_operand.vmem [shape: bf16[512,147], index: 0, kind: input, shape index: {}]   ;;  %s1941_s1 = inlined_call_operand.vmem [shape: bf16[147,128], index: 1, kind: input, shape index: {}]   ;;  %s1942_s2 = inlined_call_operand.vmem [shape: f32[1,128], index: 2, kind: input, shape index: {}]   ;;  %s1943_s3 = inlined_call_operand.vmem [shape: f32[1,128], index: 3, kind: input, shape index: {}]   ;;  %s1944_s4 = inlined_call_operand.vmem [shape: bf16[512,128], index: 4, kind: output, shape index: {}]  }
   0x1   :  { %s1735_s17 = smov 0  }
   0x2 LB: > { %s33_s18 = sadd.s32 1, %s1698_s16  ;;  %p1348_p0 = scmp.ge.s32.totalorder %s1702_s17, 1  ;;  %s1702_s17 = sphi %s1735_s17, %s14_s17   ;;  %s1698_s16 = sphi %s1733_s16, %s1946_s16   ;;  %s1694_s15 = sphi %s1731_s15, %s1945_s15  }
   0x3   : > { %p35_p1 = scmp.ge.s32.totalorder %s33_s18, 2  ;;  %p224_p2 = scmp.lt.s32.totalorder %s1702_s17, 3 }
   0x5   : > { %s1948_s18 = smov (%p35_p1, %s33_s18), 0  ;;  %p225_p3 = pnand %p1348_p0, %p224_p2 }
   0x6   : > { %v1622_v0 = vld [vmem:[%s1941_s1] sm:$0xff] (!%p225_p3)   ;;  %v1704_v1 = vmov (!%p225_p3), 0   ;;  %v1623_v2 = vld [vmem:[%s1941_s1 + $0x8] sm:$0xff] (!%p225_p3)   ;;  %v1624_v3 = vld [vmem:[%s1941_s1 + $0x10] sm:$0xff] (!%p225_p3)   ;;  %s1349_s25 = sshll.u32 (!%p225_p3), %s1694_s15, 5  ;;  %vm629_vm0 = vcmask (!%p225_p3), 154624  }
   0x7   : > { %228 = sbr.rel (%p225_p3) target bundleno = 327 (0x147), region = 36  ;;  %685 = vmatprep.subr.bf16.mxu0 (!%p225_p3), %v1704_v1  ;;  %1576 = vmatprep.subr.bf16.mxu1 (!%p225_p3), %v1704_v1  ;;  %p274_p4 = scmp.lt.s32.totalorder (!%p225_p3), %s1349_s25, 63  ;;  %v1625_v4 = vld [vmem:[%s1941_s1 + $0x18] sm:$0xff] (!%p225_p3)   ;;  %v1626_v5 = vld [vmem:[%s1941_s1 + $0x20] sm:$0xff] (!%p225_p3)   ;;  %v1627_v8 = vld [vmem:[%s1941_s1 + $0x28] sm:$0xff] (!%p225_p3)   ;;  %vm678_vm1 = vcmask (!%p225_p3), 1040384  }
   0x8   : > { %686 = vmatpush1.bf16.msra.mxu0 (!%p225_p3), %v1622_v0  ;;  %1586 = vmatpush1.bf16.msra.mxu1 (!%p225_p3), %v1622_v0  ;;  %v1628_v9 = vld [vmem:[%s1941_s1 + $0x30] sm:$0xff] (!%p225_p3)   ;;  %v1629_v10 = vld [vmem:[%s1941_s1 + $0x38] sm:$0xff] (!%p225_p3)   ;;  %vm679_vm2 = vcmask (!%p225_p3), 1041408   ;;  %v1705_v11 = vmov (!%p225_p3), 65535   ;;  %v1630_v13 = vld [vmem:[%s1941_s1 + $0x40] sm:$0xff] (!%p225_p3)  }
   0x9   : > { %687 = vmatprep.subr.bf16.mxu0 (!%p225_p3), %v1704_v1  ;;  %1577 = vmatprep.subr.bf16.mxu1 (!%p225_p3), %v1704_v1  ;;  %v680_v12 = vsel (!%p225_p3), %vm678_vm1, 4294967295, %v1705_v11  ;;  %v1631_v14 = vld [vmem:[%s1941_s1 + $0x48] ss:$0 sps:$4 sm:$0x33] (!%p225_p3)   ;;  %v1838_v47 = vld [vmem:[%s1942_s2] ss:$0 sm:$0xff] (!%p225_p3) }
   0xa   : > { %v681_v15 = vsel (!%p225_p3), %vm679_vm2, %v680_v12, 0  ;;  %v1843_v49 = vld [vmem:[%s1943_s3] ss:$0 sm:$0xff] (!%p225_p3) }
   0xb   : > { %v683_v16 = vand.u32 (!%p225_p3), %v1631_v14, %v681_v15 }
   0xc   : > { %688 = vmatpush1.bf16.msra.mxu0 (!%p225_p3), %v1623_v2  ;;  %1587 = vmatpush1.bf16.msra.mxu1 (!%p225_p3), %v1623_v2 }
   0xd   : > { %689 = vmatprep.subr.bf16.mxu0 (!%p225_p3), %v1704_v1  ;;  %1578 = vmatprep.subr.bf16.mxu1 (!%p225_p3), %v1704_v1 }
   0xe   : > { %s1950_s25 = smov (!%p274_p4, %s1349_s25), 63 }
   0xf   : > { %s1448_s28 = sshll.u32 %s1950_s25, 3  ;;  %s1353_s26 = sshll.u32 %s1950_s25, 2 }
  0x10   : > { %690 = vmatpush1.bf16.msra.mxu0 %v1624_v3  ;;  %1588 = vmatpush1.bf16.msra.mxu1 %v1624_v3  ;;  %s1767_s5 = scalar_lea.vmem %s1940_s0, %s1448_s28  ;;  %s1857_s29 = scalar_lea.vmem %s1944_s4, %s1353_s26 }
  0x11   : > { %691 = vmatprep.subr.bf16.mxu0 %v1704_v1  ;;  %1579 = vmatprep.subr.bf16.mxu1 %v1704_v1  ;;  %v1634_v6 = vld [vmem:[%s1767_s5 + $0x4] ss:$8 sps:$4 sm:$0xff]   ;;  %v1632_v17 = vld [vmem:[%s1767_s5] ss:$8 sps:$4 sm:$0xff]   ;;  %v1638_v19 = vld [vmem:[%s1767_s5 + $0x14] ss:$8 sps:$4 sm:$0xff]  }
  0x12   : > { %v1637_v7 = vld [vmem:[%s1767_s5 + $0x84] ss:$8 sps:$4 sm:$0xff]   ;;  %1396 = vmatprep.mubr.msk.bf16.mxu0 %vm629_vm0, %v1634_v6  ;;  %v1635_v18 = vld [vmem:[%s1767_s5 + $0x80] ss:$8 sps:$4 sm:$0xff]   ;;  %v1640_v20 = vld [vmem:[%s1767_s5 + $0x94] ss:$8 sps:$4 sm:$0xff]  }
  0x13   : > { %1404 = vmatprep.mubr.msk.bf16.mxu1 %vm629_vm0, %v1637_v7  ;;  %v1642_v21 = vld [vmem:[%s1767_s5 + $0x10] ss:$8 sps:$4 sm:$0xff]   ;;  %v1644_v23 = vld [vmem:[%s1767_s5 + $0x24] ss:$8 sps:$4 sm:$0xff]   ;;  %v1648_v25 = vld [vmem:[%s1767_s5 + $0x20] ss:$8 sps:$4 sm:$0xff]  }
  0x14   : > { %692 = vmatpush1.bf16.msra.mxu0 %v1625_v4  ;;  %1589 = vmatpush1.bf16.msra.mxu1 %v1625_v4  ;;  %v1643_v22 = vld [vmem:[%s1767_s5 + $0x90] ss:$8 sps:$4 sm:$0xff]   ;;  %v1646_v24 = vld [vmem:[%s1767_s5 + $0xa4] ss:$8 sps:$4 sm:$0xff]   ;;  %v1649_v26 = vld [vmem:[%s1767_s5 + $0xa0] ss:$8 sps:$4 sm:$0xff]  }
  0x15   : > { %693 = vmatprep.subr.bf16.mxu0 %v1704_v1  ;;  %1580 = vmatprep.subr.bf16.mxu1 %v1704_v1  ;;  %v1650_v27 = vld [vmem:[%s1767_s5 + $0x34] ss:$8 sps:$4 sm:$0xff]   ;;  %v1654_v29 = vld [vmem:[%s1767_s5 + $0x30] ss:$8 sps:$4 sm:$0xff]   ;;  %v1656_v31 = vld [vmem:[%s1767_s5 + $0x44] ss:$8 sps:$4 sm:$0xff]  }
  0x16   : > { %v1652_v28 = vld [vmem:[%s1767_s5 + $0xb4] ss:$8 sps:$4 sm:$0xff]   ;;  %v1655_v30 = vld [vmem:[%s1767_s5 + $0xb0] ss:$8 sps:$4 sm:$0xff]   ;;  %v1658_v32 = vld [vmem:[%s1767_s5 + $0xc4] ss:$8 sps:$4 sm:$0xff]  }
  0x17   : > { %v1660_v33 = vld [vmem:[%s1767_s5 + $0x40] ss:$8 sps:$4 sm:$0xff]   ;;  %v1662_v35 = vld [vmem:[%s1767_s5 + $0x54] ss:$8 sps:$4 sm:$0xff]   ;;  %v1666_v37 = vld [vmem:[%s1767_s5 + $0x50] ss:$8 sps:$4 sm:$0xff]  }
  0x18   : > { %694 = vmatpush1.bf16.msra.mxu0 %v1626_v5  ;;  %1590 = vmatpush1.bf16.msra.mxu1 %v1626_v5  ;;  %v1661_v34 = vld [vmem:[%s1767_s5 + $0xc0] ss:$8 sps:$4 sm:$0xff]   ;;  %v1664_v36 = vld [vmem:[%s1767_s5 + $0xd4] ss:$8 sps:$4 sm:$0xff]   ;;  %v1667_v38 = vld [vmem:[%s1767_s5 + $0xd0] ss:$8 sps:$4 sm:$0xff]  }
  0x19   : > { %695 = vmatprep.subr.bf16.mxu0 %v1704_v1  ;;  %1581 = vmatprep.subr.bf16.mxu1 %v1704_v1  ;;  %v1668_v39 = vld [vmem:[%s1767_s5 + $0x64] ss:$8 sps:$4 sm:$0xff]   ;;  %v1672_v41 = vld [vmem:[%s1767_s5 + $0x60] ss:$8 sps:$4 sm:$0xff]   ;;  %v1674_v43 = vld [vmem:[%s1767_s5 + $0x74] ss:$8 sps:$4 sm:$0xff]  }
  0x1a   : > { %v1670_v40 = vld [vmem:[%s1767_s5 + $0xe4] ss:$8 sps:$4 sm:$0xff]   ;;  %v1673_v42 = vld [vmem:[%s1767_s5 + $0xe0] ss:$8 sps:$4 sm:$0xff]   ;;  %v1676_v44 = vld [vmem:[%s1767_s5 + $0xf4] ss:$8 sps:$4 sm:$0xff]  }
  0x1b   : > { %v1678_v45 = vld [vmem:[%s1767_s5 + $0x70] ss:$8 sps:$4 sm:$0xff]  }
  0x1c   : > { %696 = vmatpush1.bf16.msra.mxu0 %v1627_v8  ;;  %1591 = vmatpush1.bf16.msra.mxu1 %v1627_v8  ;;  %v1679_v46 = vld [vmem:[%s1767_s5 + $0xf0] ss:$8 sps:$4 sm:$0xff]  }
  0x1d   : > { %697 = vmatprep.subr.bf16.mxu0 %v1704_v1  ;;  %1582 = vmatprep.subr.bf16.mxu1 %v1704_v1 }
  0x20   : > { %698 = vmatpush1.bf16.msra.mxu0 %v1628_v9  ;;  %1592 = vmatpush1.bf16.msra.mxu1 %v1628_v9 }
  0x21   : > { %699 = vmatprep.subr.bf16.mxu0 %v1704_v1  ;;  %1583 = vmatprep.subr.bf16.mxu1 %v1704_v1 }
  0x24   : > { %700 = vmatpush1.bf16.msra.mxu0 %v1629_v10  ;;  %1593 = vmatpush1.bf16.msra.mxu1 %v1629_v10 }
  0x25   : > { %701 = vmatprep.subr.bf16.mxu0 %v1704_v1  ;;  %1584 = vmatprep.subr.bf16.mxu1 %v1704_v1 }
  0x28   : > { %702 = vmatpush1.bf16.msra.mxu0 %v1630_v13  ;;  %1594 = vmatpush1.bf16.msra.mxu1 %v1630_v13 }
  0x29   : > { %703 = vmatprep.subr.bf16.mxu0 %v1704_v1  ;;  %1585 = vmatprep.subr.bf16.mxu1 %v1704_v1 }
  0x2c   : > { %704 = vmatpush1.bf16.msra.mxu0 %v683_v16  ;;  %1595 = vmatpush1.bf16.msra.mxu1 %v683_v16 }
  0x2f   : > { %718 = vmatmul.mubr.bf16.vlgmr.msra.gmra.mrb[0].mxu0 %v1632_v17  ;;  %782 = vmatmul.mubr.bf16.vlgmr.msra.gmra.mrb[0].mxu1 %v1635_v18 }
  0x30   : > { %1397 = vmatprep.mubr.msk.bf16.mxu0 %vm629_vm0, %v1638_v19  ;;  %1405 = vmatprep.mubr.msk.bf16.mxu1 %vm629_vm0, %v1640_v20 }
  0x37   : > { %726 = vmatmul.mubr.bf16.gmra.mrb[4].mxu0 %v1642_v21  ;;  %790 = vmatmul.mubr.bf16.gmra.mrb[4].mxu1 %v1643_v22 }
  0x38   : > { %1398 = vmatprep.mubr.msk.bf16.mxu0 %vm629_vm0, %v1644_v23  ;;  %1406 = vmatprep.mubr.msk.bf16.mxu1 %vm629_vm0, %v1646_v24 }
  0x3f   : > { %734 = vmatmul.mubr.bf16.gmra.mrb[8].mxu0 %v1648_v25  ;;  %798 = vmatmul.mubr.bf16.gmra.mrb[8].mxu1 %v1649_v26 }
  0x40   : > { %1399 = vmatprep.mubr.msk.bf16.mxu0 %vm629_vm0, %v1650_v27  ;;  %1407 = vmatprep.mubr.msk.bf16.mxu1 %vm629_vm0, %v1652_v28 }
  0x47   : > { %742 = vmatmul.mubr.bf16.gmra.mrb[12].mxu0 %v1654_v29  ;;  %806 = vmatmul.mubr.bf16.gmra.mrb[12].mxu1 %v1655_v30 }
  0x48   : > { %1400 = vmatprep.mubr.msk.bf16.mxu0 %vm629_vm0, %v1656_v31  ;;  %1408 = vmatprep.mubr.msk.bf16.mxu1 %vm629_vm0, %v1658_v32 }
  0x4f   : > { %750 = vmatmul.mubr.bf16.gmra.mrb[16].mxu0 %v1660_v33  ;;  %814 = vmatmul.mubr.bf16.gmra.mrb[16].mxu1 %v1661_v34 }
  0x50   : > { %1401 = vmatprep.mubr.msk.bf16.mxu0 %vm629_vm0, %v1662_v35  ;;  %1409 = vmatprep.mubr.msk.bf16.mxu1 %vm629_vm0, %v1664_v36 }
  0x57   : > { %758 = vmatmul.mubr.bf16.gmra.mrb[20].mxu0 %v1666_v37  ;;  %822 = vmatmul.mubr.bf16.gmra.mrb[20].mxu1 %v1667_v38 }
  0x58   : > { %1402 = vmatprep.mubr.msk.bf16.mxu0 %vm629_vm0, %v1668_v39  ;;  %1410 = vmatprep.mubr.msk.bf16.mxu1 %vm629_vm0, %v1670_v40 }
  0x5f   : > { %766 = vmatmul.mubr.bf16.gmra.mrb[24].mxu0 %v1672_v41  ;;  %830 = vmatmul.mubr.bf16.gmra.mrb[24].mxu1 %v1673_v42 }
  0x60   : > { %1403 = vmatprep.mubr.msk.bf16.mxu0 %vm629_vm0, %v1674_v43  ;;  %1411 = vmatprep.mubr.msk.bf16.mxu1 %vm629_vm0, %v1676_v44 }
  0x67   : > { %774 = vmatmul.mubr.bf16.gmra.mrb[28].mxu0 %v1678_v45  ;;  %838 = vmatmul.mubr.bf16.gmra.mrb[28].mxu1 %v1679_v46 }
 0x102   : > { %v719_v48 = vpop.f32.mrb[0].mxu0  ;;  %v783_v50 = vpop.f32.mrb[0].mxu1 }
 0x103   : > { %v952_v51 = vmul.f32 %v1838_v47, %v719_v48  ;;  %v968_v52 = vmul.f32 %v1838_v47, %v783_v50  ;;  %v721_v53 = vpop.f32.mrb[1].mxu0  ;;  %v785_v54 = vpop.f32.mrb[1].mxu1 }
 0x104   : > { %v722_v55 = vpop.f32.mrb[2].mxu0  ;;  %v786_v56 = vpop.f32.mrb[2].mxu1 }
 0x105   : > { %v991_v57 = vadd.f32 %v1843_v49, %v952_v51  ;;  %v1007_v58 = vadd.f32 %v1843_v49, %v968_v52  ;;  %v953_v59 = vmul.f32 %v1838_v47, %v722_v55  ;;  %v969_v60 = vmul.f32 %v1838_v47, %v786_v56  ;;  %v724_v61 = vpop.f32.mrb[3].mxu0  ;;  %v788_v62 = vpop.f32.mrb[3].mxu1 }
 0x107   : > { %v992_v63 = vadd.f32 %v1843_v49, %v953_v59  ;;  %v1008_v0 = vadd.f32 %v1843_v49, %v969_v60  ;;  %v1023_v1 = vmax.f32 %v991_v57, 0.0  ;;  %v1039_v2 = vmax.f32 %v1007_v58, 0.0 }
 0x109   : > { %v1024_v3 = vmax.f32 %v992_v63, 0.0  ;;  %v1040_v4 = vmax.f32 %v1008_v0, 0.0 }
 0x10a   : > { %v727_v5 = vpop.f32.mrb[4].mxu0  ;;  %v791_v6 = vpop.f32.mrb[4].mxu1 }
 0x10b   : > { %v1484_v7 = vpack.c.bf16 %v1024_v3, %v1023_v1  ;;  %v1524_v8 = vpack.c.bf16 %v1040_v4, %v1039_v2  ;;  %v954_v9 = vmul.f32 %v1838_v47, %v727_v5  ;;  %v970_v10 = vmul.f32 %v1838_v47, %v791_v6  ;;  %v729_v11 = vpop.f32.mrb[5].mxu0  ;;  %v793_v12 = vpop.f32.mrb[5].mxu1 }
 0x10c   : > { %v730_v13 = vpop.f32.mrb[6].mxu0  ;;  %v794_v14 = vpop.f32.mrb[6].mxu1 }
 0x10d   : > { %1485 = vst [vmem:[%s1857_s29] sm:$0xff] %v1484_v7   ;;  %1568 = vst [vmem:[%s1857_s29 + $0x40] sm:$0xff] %v1524_v8   ;;  %v993_v15 = vadd.f32 %v1843_v49, %v954_v9  ;;  %v1009_v16 = vadd.f32 %v1843_v49, %v970_v10  ;;  %v955_v17 = vmul.f32 %v1838_v47, %v730_v13  ;;  %v732_v19 = vpop.f32.mrb[7].mxu0  ;;  %v796_v20 = vpop.f32.mrb[7].mxu1 }
 0x10e   : > { %v971_v18 = vmul.f32 %v1838_v47, %v794_v14 }
 0x10f   : > { %v994_v21 = vadd.f32 %v1843_v49, %v955_v17  ;;  %v1025_v23 = vmax.f32 %v993_v15, 0.0  ;;  %v1041_v24 = vmax.f32 %v1009_v16, 0.0 }
 0x110   : > { %v1010_v22 = vadd.f32 %v1843_v49, %v971_v18 }
 0x111   : > { %v1026_v25 = vmax.f32 %v994_v21, 0.0 }
 0x112   : > { %v1042_v26 = vmax.f32 %v1010_v22, 0.0  ;;  %v735_v27 = vpop.f32.mrb[8].mxu0  ;;  %v799_v28 = vpop.f32.mrb[8].mxu1 }
 0x113   : > { %v1489_v29 = vpack.c.bf16 %v1026_v25, %v1025_v23  ;;  %v956_v31 = vmul.f32 %v1838_v47, %v735_v27  ;;  %v972_v32 = vmul.f32 %v1838_v47, %v799_v28  ;;  %v737_v33 = vpop.f32.mrb[9].mxu0  ;;  %v801_v34 = vpop.f32.mrb[9].mxu1 }
 0x114   : > { %v1529_v30 = vpack.c.bf16 %v1042_v26, %v1041_v24  ;;  %v738_v35 = vpop.f32.mrb[10].mxu0  ;;  %v802_v36 = vpop.f32.mrb[10].mxu1 }
 0x115   : > { %1561 = vst [vmem:[%s1857_s29 + $0x8] sm:$0xff] %v1489_v29   ;;  %v995_v37 = vadd.f32 %v1843_v49, %v956_v31  ;;  %v1011_v38 = vadd.f32 %v1843_v49, %v972_v32  ;;  %v957_v39 = vmul.f32 %v1838_v47, %v738_v35  ;;  %v973_v40 = vmul.f32 %v1838_v47, %v802_v36  ;;  %v740_v41 = vpop.f32.mrb[11].mxu0  ;;  %v804_v42 = vpop.f32.mrb[11].mxu1 }
 0x116   : > { %1569 = vst [vmem:[%s1857_s29 + $0x48] sm:$0xff] %v1529_v30  }
 0x117   : > { %v996_v43 = vadd.f32 %v1843_v49, %v957_v39  ;;  %v1012_v44 = vadd.f32 %v1843_v49, %v973_v40  ;;  %v1027_v45 = vmax.f32 %v995_v37, 0.0  ;;  %v1043_v46 = vmax.f32 %v1011_v38, 0.0 }
 0x119   : > { %v1028_v48 = vmax.f32 %v996_v43, 0.0  ;;  %v1044_v50 = vmax.f32 %v1012_v44, 0.0 }
 0x11a   : > { %v743_v51 = vpop.f32.mrb[12].mxu0  ;;  %v807_v52 = vpop.f32.mrb[12].mxu1 }
 0x11b   : > { %v1494_v53 = vpack.c.bf16 %v1028_v48, %v1027_v45  ;;  %v1534_v54 = vpack.c.bf16 %v1044_v50, %v1043_v46  ;;  %v958_v55 = vmul.f32 %v1838_v47, %v743_v51  ;;  %v974_v56 = vmul.f32 %v1838_v47, %v807_v52  ;;  %v745_v57 = vpop.f32.mrb[13].mxu0  ;;  %v809_v58 = vpop.f32.mrb[13].mxu1 }
 0x11c   : > { %v746_v59 = vpop.f32.mrb[14].mxu0  ;;  %v810_v60 = vpop.f32.mrb[14].mxu1 }
 0x11d   : > { %1562 = vst [vmem:[%s1857_s29 + $0x10] sm:$0xff] %v1494_v53   ;;  %1570 = vst [vmem:[%s1857_s29 + $0x50] sm:$0xff] %v1534_v54   ;;  %v997_v61 = vadd.f32 %v1843_v49, %v958_v55  ;;  %v1013_v62 = vadd.f32 %v1843_v49, %v974_v56  ;;  %v959_v63 = vmul.f32 %v1838_v47, %v746_v59  ;;  %v748_v1 = vpop.f32.mrb[15].mxu0  ;;  %v812_v2 = vpop.f32.mrb[15].mxu1 }
 0x11e   : > { %v975_v0 = vmul.f32 %v1838_v47, %v810_v60 }
 0x11f   : > { %v998_v3 = vadd.f32 %v1843_v49, %v959_v63  ;;  %v1029_v5 = vmax.f32 %v997_v61, 0.0  ;;  %v1045_v6 = vmax.f32 %v1013_v62, 0.0 }
 0x120   : > { %v1014_v4 = vadd.f32 %v1843_v49, %v975_v0 }
 0x121   : > { %v1030_v7 = vmax.f32 %v998_v3, 0.0 }
 0x122   : > { %v1046_v8 = vmax.f32 %v1014_v4, 0.0  ;;  %v751_v9 = vpop.f32.mrb[16].mxu0  ;;  %v815_v10 = vpop.f32.mrb[16].mxu1 }
 0x123   : > { %v1499_v11 = vpack.c.bf16 %v1030_v7, %v1029_v5  ;;  %v960_v13 = vmul.f32 %v1838_v47, %v751_v9  ;;  %v976_v14 = vmul.f32 %v1838_v47, %v815_v10  ;;  %v753_v15 = vpop.f32.mrb[17].mxu0  ;;  %v817_v16 = vpop.f32.mrb[17].mxu1 }
 0x124   : > { %v1539_v12 = vpack.c.bf16 %v1046_v8, %v1045_v6  ;;  %v754_v17 = vpop.f32.mrb[18].mxu0  ;;  %v818_v18 = vpop.f32.mrb[18].mxu1 }
 0x125   : > { %1563 = vst [vmem:[%s1857_s29 + $0x18] sm:$0xff] %v1499_v11   ;;  %v999_v19 = vadd.f32 %v1843_v49, %v960_v13  ;;  %v1015_v20 = vadd.f32 %v1843_v49, %v976_v14  ;;  %v961_v21 = vmul.f32 %v1838_v47, %v754_v17  ;;  %v977_v22 = vmul.f32 %v1838_v47, %v818_v18  ;;  %v756_v23 = vpop.f32.mrb[19].mxu0  ;;  %v820_v24 = vpop.f32.mrb[19].mxu1 }
 0x126   : > { %1571 = vst [vmem:[%s1857_s29 + $0x58] sm:$0xff] %v1539_v12  }
 0x127   : > { %v1000_v25 = vadd.f32 %v1843_v49, %v961_v21  ;;  %v1016_v26 = vadd.f32 %v1843_v49, %v977_v22  ;;  %v1031_v27 = vmax.f32 %v999_v19, 0.0  ;;  %v1047_v28 = vmax.f32 %v1015_v20, 0.0 }
 0x129   : > { %v1032_v29 = vmax.f32 %v1000_v25, 0.0  ;;  %v1048_v30 = vmax.f32 %v1016_v26, 0.0 }
 0x12a   : > { %v759_v31 = vpop.f32.mrb[20].mxu0  ;;  %v823_v32 = vpop.f32.mrb[20].mxu1 }
 0x12b   : > { %v1504_v33 = vpack.c.bf16 %v1032_v29, %v1031_v27  ;;  %v1544_v34 = vpack.c.bf16 %v1048_v30, %v1047_v28  ;;  %v962_v35 = vmul.f32 %v1838_v47, %v759_v31  ;;  %v978_v36 = vmul.f32 %v1838_v47, %v823_v32  ;;  %v761_v37 = vpop.f32.mrb[21].mxu0  ;;  %v825_v38 = vpop.f32.mrb[21].mxu1 }
 0x12c   : > { %v762_v39 = vpop.f32.mrb[22].mxu0  ;;  %v826_v40 = vpop.f32.mrb[22].mxu1 }
 0x12d   : > { %1564 = vst [vmem:[%s1857_s29 + $0x20] sm:$0xff] %v1504_v33   ;;  %1572 = vst [vmem:[%s1857_s29 + $0x60] sm:$0xff] %v1544_v34   ;;  %v1001_v41 = vadd.f32 %v1843_v49, %v962_v35  ;;  %v1017_v42 = vadd.f32 %v1843_v49, %v978_v36  ;;  %v963_v43 = vmul.f32 %v1838_v47, %v762_v39  ;;  %v764_v45 = vpop.f32.mrb[23].mxu0  ;;  %v828_v46 = vpop.f32.mrb[23].mxu1 }
 0x12e   : > { %v979_v44 = vmul.f32 %v1838_v47, %v826_v40 }
 0x12f   : > { %v1002_v48 = vadd.f32 %v1843_v49, %v963_v43  ;;  %v1033_v51 = vmax.f32 %v1001_v41, 0.0  ;;  %v1049_v52 = vmax.f32 %v1017_v42, 0.0 }
 0x130   : > { %v1018_v50 = vadd.f32 %v1843_v49, %v979_v44 }
 0x131   : > { %v1034_v53 = vmax.f32 %v1002_v48, 0.0 }
 0x132   : > { %v1050_v54 = vmax.f32 %v1018_v50, 0.0  ;;  %v767_v55 = vpop.f32.mrb[24].mxu0  ;;  %v831_v56 = vpop.f32.mrb[24].mxu1 }
 0x133   : > { %v1509_v57 = vpack.c.bf16 %v1034_v53, %v1033_v51  ;;  %v964_v59 = vmul.f32 %v1838_v47, %v767_v55  ;;  %v980_v60 = vmul.f32 %v1838_v47, %v831_v56  ;;  %v769_v61 = vpop.f32.mrb[25].mxu0  ;;  %v833_v62 = vpop.f32.mrb[25].mxu1 }
 0x134   : > { %v1549_v58 = vpack.c.bf16 %v1050_v54, %v1049_v52  ;;  %v770_v63 = vpop.f32.mrb[26].mxu0  ;;  %v834_v0 = vpop.f32.mrb[26].mxu1 }
 0x135   : > { %1565 = vst [vmem:[%s1857_s29 + $0x28] sm:$0xff] %v1509_v57   ;;  %v1003_v1 = vadd.f32 %v1843_v49, %v964_v59  ;;  %v1019_v2 = vadd.f32 %v1843_v49, %v980_v60  ;;  %v965_v3 = vmul.f32 %v1838_v47, %v770_v63  ;;  %v981_v4 = vmul.f32 %v1838_v47, %v834_v0  ;;  %v772_v5 = vpop.f32.mrb[27].mxu0  ;;  %v836_v6 = vpop.f32.mrb[27].mxu1 }
 0x136   : > { %1573 = vst [vmem:[%s1857_s29 + $0x68] sm:$0xff] %v1549_v58  }
 0x137   : > { %v1004_v7 = vadd.f32 %v1843_v49, %v965_v3  ;;  %v1020_v8 = vadd.f32 %v1843_v49, %v981_v4  ;;  %v1035_v9 = vmax.f32 %v1003_v1, 0.0  ;;  %v1051_v10 = vmax.f32 %v1019_v2, 0.0 }
 0x139   : > { %v1036_v11 = vmax.f32 %v1004_v7, 0.0  ;;  %v1052_v12 = vmax.f32 %v1020_v8, 0.0 }
 0x13a   : > { %v775_v13 = vpop.f32.mrb[28].mxu0  ;;  %v839_v14 = vpop.f32.mrb[28].mxu1 }
 0x13b   : > { %v1514_v15 = vpack.c.bf16 %v1036_v11, %v1035_v9  ;;  %v1554_v16 = vpack.c.bf16 %v1052_v12, %v1051_v10  ;;  %v966_v17 = vmul.f32 %v1838_v47, %v775_v13  ;;  %v982_v18 = vmul.f32 %v1838_v47, %v839_v14  ;;  %v777_v19 = vpop.f32.mrb[29].mxu0  ;;  %v841_v20 = vpop.f32.mrb[29].mxu1 }
 0x13c   : > { %v778_v21 = vpop.f32.mrb[30].mxu0  ;;  %v842_v22 = vpop.f32.mrb[30].mxu1 }
 0x13d   : > { %1566 = vst [vmem:[%s1857_s29 + $0x30] sm:$0xff] %v1514_v15   ;;  %1574 = vst [vmem:[%s1857_s29 + $0x70] sm:$0xff] %v1554_v16   ;;  %v1005_v23 = vadd.f32 %v1843_v49, %v966_v17  ;;  %v1021_v24 = vadd.f32 %v1843_v49, %v982_v18  ;;  %v967_v25 = vmul.f32 %v1838_v47, %v778_v21  ;;  %v780_v27 = vpop.f32.mrb[31].mxu0  ;;  %v844_v28 = vpop.f32.mrb[31].mxu1 }
 0x13e   : > { %v983_v26 = vmul.f32 %v1838_v47, %v842_v22 }
 0x13f   : > { %v1006_v29 = vadd.f32 %v1843_v49, %v967_v25  ;;  %v1037_v31 = vmax.f32 %v1005_v23, 0.0  ;;  %v1053_v32 = vmax.f32 %v1021_v24, 0.0 }
 0x140   : > { %v1022_v30 = vadd.f32 %v1843_v49, %v983_v26 }
 0x141   : > { %v1038_v33 = vmax.f32 %v1006_v29, 0.0 }
 0x142   : > { %v1054_v34 = vmax.f32 %v1022_v30, 0.0 }
 0x143   : > { %v1519_v35 = vpack.c.bf16 %v1038_v33, %v1037_v31 }
 0x144   : > { %v1559_v36 = vpack.c.bf16 %v1054_v34, %v1053_v32 }
 0x145   : > { %1567 = vst [vmem:[%s1857_s29 + $0x38] sm:$0xff] %v1519_v35  }
 0x146   : > { %1575 = vst [vmem:[%s1857_s29 + $0x78] sm:$0xff] %v1559_v36  }
 0x147 PF: > { %s14_s17 = sadd.s32 1, %s1702_s17   ;;  %s1945_s15 = smov %s1698_s16 }
 0x148   : > { %p11_p5 = scmp.ge.s32.totalorder %s14_s17, 4   ;;  %s1946_s16 = smov %s1948_s18 }
 0x14a   :  { %13 = sbr.rel (!%p11_p5) target bundleno = 2 (0x2), region = 83 }

</bundles_post_ra>
